<compile_context>
chip_gen: v6e
topology: v6e:2x2x1
jax: 0.10.0
libtpu: 0.0.40
codegen_flags: <defaults>
</compile_context>

<pallas_src>
import functools

import jax
import jax.numpy as jnp
from jax.experimental import pallas as pl
from jax.experimental.pallas import tpu as pltpu

NUM_LAYERS = 5
LANE = 128


def _round_up(n, m):
    return ((n + m - 1) // m) * m


def _mlp_kernel(x_ref, w1_ref, wrest_ref, b_ref, o_ref):
    """One batch tile of the 5-layer MLP.

    x_ref:     (tm, input_size)              f32
    w1_ref:    (input_size, d_pad)           bf16 (zero-padded cols)
    wrest_ref: (NUM_LAYERS-1, d_pad, d_pad)  bf16 (zero-padded)
    b_ref:     (NUM_LAYERS, 1, d_pad)        f32  (zero-padded)
    o_ref:     (tm, out_size)                f32
    Padded lanes stay exactly zero through the ReLU chain, so the chained
    GEMMs are exact for the valid sub-blocks.  Dropout = identity (eval).
    """
    out_size = o_ref.shape[-1]

    # fc1: K = input_size (unpadded).  bf16 operands on the MXU, f32 accum.
    h = jnp.dot(x_ref[...].astype(jnp.bfloat16), w1_ref[...],
                preferred_element_type=jnp.float32)
    h = jnp.maximum(h + b_ref[0], 0.0)

    # fc2..fc4: dots in bf16 on the MXU, bias + ReLU in f32 on the VPU.
    for i in range(1, NUM_LAYERS - 1):
        h = jnp.dot(h.astype(jnp.bfloat16), wrest_ref[i - 1],
                    preferred_element_type=jnp.float32)
        h = jnp.maximum(h + b_ref[i], 0.0)

    # fc5: no activation; only the first `out_size` lanes are valid.
    h = jnp.dot(h.astype(jnp.bfloat16), wrest_ref[NUM_LAYERS - 2],
                preferred_element_type=jnp.float32)
    h = h + b_ref[NUM_LAYERS - 1]
    o_ref[...] = h[:, :out_size].astype(o_ref.dtype)


def pack_params(params):
    """Pack (w_i: (in,out), b_i: (1,out)) params into the 3 kernel arrays.
    Call ONCE outside the per-forward path (perf review item)."""
    out_size = params[f"w{NUM_LAYERS}"].shape[1]
    input_size = params["w1"].shape[0]
    d_pad = _round_up(max(params[f"w{i}"].shape[1]
                          for i in range(1, NUM_LAYERS + 1)), LANE)

    def pad2(a, rows, cols):
        a = a.astype(jnp.float32)
        return jnp.pad(a, ((0, rows - a.shape[0]), (0, cols - a.shape[1])))

    w1p = pad2(params["w1"], input_size, d_pad).astype(jnp.bfloat16)
    wrest = jnp.stack([pad2(params[f"w{i}"], d_pad, d_pad)
                       for i in range(2, NUM_LAYERS + 1)]).astype(jnp.bfloat16)
    bpack = jnp.stack([pad2(params[f"b{i}"].reshape(1, -1), 1, d_pad)
                       for i in range(1, NUM_LAYERS + 1)])  # f32
    return w1p, wrest, bpack, out_size


@functools.partial(jax.jit, static_argnames=("out_size", "tm"))
def _mlp_mach2_call(x, w1p, wrest, bpack, *, out_size, tm):
    B, input_size = x.shape
    d_pad = w1p.shape[1]
    grid = (pl.cdiv(B, tm),)

    in_specs = [
        pl.BlockSpec((tm, input_size), lambda i: (i, 0)),                   # x tile
        pl.BlockSpec((input_size, d_pad), lambda i: (0, 0)),                # fc1 W (resident)
        pl.BlockSpec((NUM_LAYERS - 1, d_pad, d_pad), lambda i: (0, 0, 0)),  # fc2..5 W (resident)
        pl.BlockSpec((NUM_LAYERS, 1, d_pad), lambda i: (0, 0, 0)),          # biases (resident)
    ]
    out_specs = pl.BlockSpec((tm, out_size), lambda i: (i, 0))

    cost = pl.CostEstimate(
        flops=2 * B * d_pad * (input_size + (NUM_LAYERS - 1) * d_pad),
        transcendentals=0,
        bytes_accessed=(4 * B * input_size                 # x (f32)
                        + 2 * input_size * d_pad           # w1 (bf16)
                        + 2 * (NUM_LAYERS - 1) * d_pad**2  # w2..w5 (bf16)
                        + 4 * NUM_LAYERS * d_pad           # biases (f32)
                        + 4 * B * out_size),               # output (f32)
    )

    return pl.pallas_call(
        _mlp_kernel,
        out_shape=jax.ShapeDtypeStruct((B, out_size), jnp.float32),
        grid=grid,
        in_specs=in_specs,
        out_specs=out_specs,
        compiler_params=pltpu.CompilerParams(
            dimension_semantics=("parallel",)),
        cost_estimate=cost,
    )(x, w1p, wrest, bpack)


def mlp_mach2_forward(x, packed, *, tm=None):
    """x: (B, input_size) f32; packed = pack_params(params).
    Returns (B, 2) f32, matching MLP_mach2.forward in eval mode."""
    w1p, wrest, bpack, out_size = packed
    B = x.shape[0]
    if tm is None:
        # Big tiles amortize the ~0.35 us/step overhead and the serial 5-dot
        # chain; cap so there are >= 2 grid steps (v7x has 2 TensorCores).
        tm = max(8, min(1024, _round_up(-(-B // 2), 8)))
    return _mlp_mach2_call(x.astype(jnp.float32), w1p, wrest, bpack,
                           out_size=out_size, tm=tm)


def init_params(key, input_size, h1, h2, h3, h4, out_size=2):
    """Deterministic init mimicking nn.Linear's U(-1/sqrt(fan_in), 1/sqrt(fan_in))."""
    dims = [(input_size, h1), (h1, h2), (h2, h3), (h3, h4), (h4, out_size)]
    params = {}
    for i, (fan_in, fan_out) in enumerate(dims, start=1):
        key, kw, kb = jax.random.split(key, 3)
        bound = 1.0 / jnp.sqrt(jnp.float32(fan_in))
        params[f"w{i}"] = jax.random.uniform(
            kw, (fan_in, fan_out), jnp.float32, minval=-bound, maxval=bound)
        params[f"b{i}"] = jax.random.uniform(
            kb, (1, fan_out), jnp.float32, minval=-bound, maxval=bound)
    return params


def reference_forward_f32(x, params):
    h = x.astype(jnp.float32)
    for i in range(1, NUM_LAYERS):
        h = jnp.maximum(h @ params[f"w{i}"] + params[f"b{i}"], 0.0)
    return h @ params[f"w{NUM_LAYERS}"] + params[f"b{NUM_LAYERS}"]


def reference_forward_bf16(x, params):
    """Same precision recipe as the kernel: bf16 dot operands, f32 accumulation,
    bias + ReLU in f32."""
    h = x.astype(jnp.float32)
    for i in range(1, NUM_LAYERS + 1):
        h = jnp.dot(h.astype(jnp.bfloat16),
                    params[f"w{i}"].astype(jnp.bfloat16),
                    preferred_element_type=jnp.float32)
        h = h + params[f"b{i}"].astype(jnp.float32)
        if i < NUM_LAYERS:
            h = jnp.maximum(h, 0.0)
    return h


if __name__ == "__main__":
    key = jax.random.PRNGKey(0)
    B, input_size, h1, h2, h3, h4 = 8, 32, 64, 64, 32, 32

    key, kx = jax.random.split(key)
    x = jax.random.normal(kx, (B, input_size), jnp.float32)
    params = init_params(key, input_size, h1, h2, h3, h4)
    packed = pack_params(params)  # hoisted: packed once, reused by every forward

    out = mlp_mach2_forward(x, packed)
    jax.block_until_ready(out)

    assert out.shape == (B, 2), out.shape
    ref_bf = reference_forward_bf16(x, params)
    ref_32 = reference_forward_f32(x, params)
    assert jnp.allclose(out, ref_bf, atol=2e-3, rtol=2e-3), "mismatch vs bf16-precision reference"
    assert jnp.allclose(out, ref_32, atol=5e-2, rtol=5e-2), "mismatch vs f32 reference"

    # Multi-step, ragged-edge grid path (B=500 not a multiple of tm=256 -> 2 steps).
    key, kx2 = jax.random.split(key)
    xb = jax.random.normal(kx2, (500, input_size), jnp.float32)
    outb = mlp_mach2_forward(xb, packed)
    jax.block_until_ready(outb)
    refb_bf = reference_forward_bf16(xb, params)
    refb_32 = reference_forward_f32(xb, params)
    assert outb.shape == (500, 2), outb.shape
    assert jnp.allclose(outb, refb_bf, atol=2e-3, rtol=2e-3), "batched mismatch (bf16 ref)"
    assert jnp.allclose(outb, refb_32, atol=5e-2, rtol=5e-2), "batched mismatch (f32 ref)"

    print("KERNEL_OK")
</pallas_src>

<mosaic_0001>
module attributes {stable_mosaic.version = 11 : i64} {
  func.func @_mlp_kernel(%arg0: i32, %arg1: memref<8x32xf32, #tpu.memory_space<vmem>>, %arg2: memref<32x128xbf16, #tpu.memory_space<vmem>>, %arg3: memref<4x128x128xbf16, #tpu.memory_space<vmem>>, %arg4: memref<5x1x128xf32, #tpu.memory_space<vmem>>, %arg5: memref<8x2xf32, #tpu.memory_space<vmem>>) attributes {dimension_semantics = [#tpu.dimension_semantics<parallel>], iteration_bounds = array<i64: 1>, scalar_prefetch = 0 : i64, scratch_operands = 0 : i64, tpu.core_type = #tpu.core_type<tc>, window_params = [{transform_indices = @transform_0, window_bounds = array<i64: 8, 32>}, {pipeline_mode = #tpu.pipeline_mode<synchronous>, transform_indices = @transform_1, window_bounds = array<i64: 32, 128>}, {pipeline_mode = #tpu.pipeline_mode<synchronous>, transform_indices = @transform_2, window_bounds = array<i64: 4, 128, 128>}, {pipeline_mode = #tpu.pipeline_mode<synchronous>, transform_indices = @transform_3, window_bounds = array<i64: 5, 1, 128>}, {transform_indices = @transform_4, window_bounds = array<i64: 8, 2>}]} {
    %c0 = arith.constant 0 : index
    %c0_0 = arith.constant 0 : index
    %0 = vector.load %arg1[%c0, %c0_0] : memref<8x32xf32, #tpu.memory_space<vmem>>, vector<8x32xf32>
    %1 = arith.truncf %0 : vector<8x32xf32> to vector<8x32xbf16>
    %c0_1 = arith.constant 0 : index
    %c0_2 = arith.constant 0 : index
    %2 = vector.load %arg2[%c0_1, %c0_2] : memref<32x128xbf16, #tpu.memory_space<vmem>>, vector<32x128xbf16>
    %cst = arith.constant dense<0.000000e+00> : vector<8x128xf32>
    %3 = tpu.matmul %1, %2, %cst {dimension_numbers = #tpu.dot_dimension_numbers<[1], [0], [0], [1], [0, 0, 1, 1], [], []>} : vector<8x32xbf16>, vector<32x128xbf16>, vector<8x128xf32> -> vector<8x128xf32>
    %c0_3 = arith.constant 0 : index
    %c0_4 = arith.constant 0 : index
    %c0_5 = arith.constant 0 : index
    %4 = vector.load %arg4[%c0_3, %c0_4, %c0_5] : memref<5x1x128xf32, #tpu.memory_space<vmem>>, vector<1x1x128xf32>
    %5 = vector.shape_cast %4 : vector<1x1x128xf32> to vector<1x128xf32>
    %6 = vector.broadcast %5 : vector<1x128xf32> to vector<8x128xf32>
    %7 = arith.addf %3, %6 : vector<8x128xf32>
    %cst_6 = arith.constant 0.000000e+00 : f32
    %8 = vector.broadcast %cst_6 : f32 to vector<8x128xf32>
    %9 = arith.maximumf %7, %8 : vector<8x128xf32>
    %10 = arith.truncf %9 : vector<8x128xf32> to vector<8x128xbf16>
    %c0_7 = arith.constant 0 : index
    %c0_8 = arith.constant 0 : index
    %c0_9 = arith.constant 0 : index
    %11 = vector.load %arg3[%c0_7, %c0_8, %c0_9] : memref<4x128x128xbf16, #tpu.memory_space<vmem>>, vector<1x128x128xbf16>
    %12 = vector.shape_cast %11 : vector<1x128x128xbf16> to vector<128x128xbf16>
    %cst_10 = arith.constant dense<0.000000e+00> : vector<8x128xf32>
    %13 = tpu.matmul %10, %12, %cst_10 {dimension_numbers = #tpu.dot_dimension_numbers<[1], [0], [0], [1], [0, 0, 1, 1], [], []>} : vector<8x128xbf16>, vector<128x128xbf16>, vector<8x128xf32> -> vector<8x128xf32>
    %c1 = arith.constant 1 : index
    %c0_11 = arith.constant 0 : index
    %c0_12 = arith.constant 0 : index
    %14 = vector.load %arg4[%c1, %c0_11, %c0_12] : memref<5x1x128xf32, #tpu.memory_space<vmem>>, vector<1x1x128xf32>
    %15 = vector.shape_cast %14 : vector<1x1x128xf32> to vector<1x128xf32>
    %16 = vector.broadcast %15 : vector<1x128xf32> to vector<8x128xf32>
    %17 = arith.addf %13, %16 : vector<8x128xf32>
    %cst_13 = arith.constant 0.000000e+00 : f32
    %18 = vector.broadcast %cst_13 : f32 to vector<8x128xf32>
    %19 = arith.maximumf %17, %18 : vector<8x128xf32>
    %20 = arith.truncf %19 : vector<8x128xf32> to vector<8x128xbf16>
    %c1_14 = arith.constant 1 : index
    %c0_15 = arith.constant 0 : index
    %c0_16 = arith.constant 0 : index
    %21 = vector.load %arg3[%c1_14, %c0_15, %c0_16] : memref<4x128x128xbf16, #tpu.memory_space<vmem>>, vector<1x128x128xbf16>
    %22 = vector.shape_cast %21 : vector<1x128x128xbf16> to vector<128x128xbf16>
    %cst_17 = arith.constant dense<0.000000e+00> : vector<8x128xf32>
    %23 = tpu.matmul %20, %22, %cst_17 {dimension_numbers = #tpu.dot_dimension_numbers<[1], [0], [0], [1], [0, 0, 1, 1], [], []>} : vector<8x128xbf16>, vector<128x128xbf16>, vector<8x128xf32> -> vector<8x128xf32>
    %c2 = arith.constant 2 : index
    %c0_18 = arith.constant 0 : index
    %c0_19 = arith.constant 0 : index
    %24 = vector.load %arg4[%c2, %c0_18, %c0_19] : memref<5x1x128xf32, #tpu.memory_space<vmem>>, vector<1x1x128xf32>
    %25 = vector.shape_cast %24 : vector<1x1x128xf32> to vector<1x128xf32>
    %26 = vector.broadcast %25 : vector<1x128xf32> to vector<8x128xf32>
    %27 = arith.addf %23, %26 : vector<8x128xf32>
    %cst_20 = arith.constant 0.000000e+00 : f32
    %28 = vector.broadcast %cst_20 : f32 to vector<8x128xf32>
    %29 = arith.maximumf %27, %28 : vector<8x128xf32>
    %30 = arith.truncf %29 : vector<8x128xf32> to vector<8x128xbf16>
    %c2_21 = arith.constant 2 : index
    %c0_22 = arith.constant 0 : index
    %c0_23 = arith.constant 0 : index
    %31 = vector.load %arg3[%c2_21, %c0_22, %c0_23] : memref<4x128x128xbf16, #tpu.memory_space<vmem>>, vector<1x128x128xbf16>
    %32 = vector.shape_cast %31 : vector<1x128x128xbf16> to vector<128x128xbf16>
    %cst_24 = arith.constant dense<0.000000e+00> : vector<8x128xf32>
    %33 = tpu.matmul %30, %32, %cst_24 {dimension_numbers = #tpu.dot_dimension_numbers<[1], [0], [0], [1], [0, 0, 1, 1], [], []>} : vector<8x128xbf16>, vector<128x128xbf16>, vector<8x128xf32> -> vector<8x128xf32>
    %c3 = arith.constant 3 : index
    %c0_25 = arith.constant 0 : index
    %c0_26 = arith.constant 0 : index
    %34 = vector.load %arg4[%c3, %c0_25, %c0_26] : memref<5x1x128xf32, #tpu.memory_space<vmem>>, vector<1x1x128xf32>
    %35 = vector.shape_cast %34 : vector<1x1x128xf32> to vector<1x128xf32>
    %36 = vector.broadcast %35 : vector<1x128xf32> to vector<8x128xf32>
    %37 = arith.addf %33, %36 : vector<8x128xf32>
    %cst_27 = arith.constant 0.000000e+00 : f32
    %38 = vector.broadcast %cst_27 : f32 to vector<8x128xf32>
    %39 = arith.maximumf %37, %38 : vector<8x128xf32>
    %40 = arith.truncf %39 : vector<8x128xf32> to vector<8x128xbf16>
    %c3_28 = arith.constant 3 : index
    %c0_29 = arith.constant 0 : index
    %c0_30 = arith.constant 0 : index
    %41 = vector.load %arg3[%c3_28, %c0_29, %c0_30] : memref<4x128x128xbf16, #tpu.memory_space<vmem>>, vector<1x128x128xbf16>
    %42 = vector.shape_cast %41 : vector<1x128x128xbf16> to vector<128x128xbf16>
    %cst_31 = arith.constant dense<0.000000e+00> : vector<8x128xf32>
    %43 = tpu.matmul %40, %42, %cst_31 {dimension_numbers = #tpu.dot_dimension_numbers<[1], [0], [0], [1], [0, 0, 1, 1], [], []>} : vector<8x128xbf16>, vector<128x128xbf16>, vector<8x128xf32> -> vector<8x128xf32>
    %c4 = arith.constant 4 : index
    %c0_32 = arith.constant 0 : index
    %c0_33 = arith.constant 0 : index
    %44 = vector.load %arg4[%c4, %c0_32, %c0_33] : memref<5x1x128xf32, #tpu.memory_space<vmem>>, vector<1x1x128xf32>
    %45 = vector.shape_cast %44 : vector<1x1x128xf32> to vector<1x128xf32>
    %46 = vector.broadcast %45 : vector<1x128xf32> to vector<8x128xf32>
    %47 = arith.addf %43, %46 : vector<8x128xf32>
    %48 = vector.extract_strided_slice %47 {offsets = [0, 0], sizes = [8, 2], strides = [1, 1]} : vector<8x128xf32> to vector<8x2xf32>
    %c0_34 = arith.constant 0 : index
    %c0_35 = arith.constant 0 : index
    %49 = vector.load %arg5[%c0_34, %c0_35] : memref<8x2xf32, #tpu.memory_space<vmem>>, vector<8x2xf32>
    tpu.vector_store %arg5[%c0_34, %c0_35], %48 {strides = array<i32>} : memref<8x2xf32, #tpu.memory_space<vmem>>, vector<8x2xf32>,
    return
  }
  func.func @transform_0(%arg0: i32) -> (i32, i32) {
    %c0_i32 = arith.constant 0 : i32
    %c0_i32_0 = arith.constant 0 : i32
    return %arg0, %c0_i32 : i32, i32
  }
  func.func @transform_1(%arg0: i32) -> (i32, i32) {
    %c0_i32 = arith.constant 0 : i32
    %c0_i32_0 = arith.constant 0 : i32
    %c0_i32_1 = arith.constant 0 : i32
    return %c0_i32, %c0_i32_0 : i32, i32
  }
  func.func @transform_2(%arg0: i32) -> (i32, i32, i32) {
    %c0_i32 = arith.constant 0 : i32
    %c0_i32_0 = arith.constant 0 : i32
    %c0_i32_1 = arith.constant 0 : i32
    %c0_i32_2 = arith.constant 0 : i32
    return %c0_i32, %c0_i32_0, %c0_i32_1 : i32, i32, i32
  }
  func.func @transform_3(%arg0: i32) -> (i32, i32, i32) {
    %c0_i32 = arith.constant 0 : i32
    %c0_i32_0 = arith.constant 0 : i32
    %c0_i32_1 = arith.constant 0 : i32
    %c0_i32_2 = arith.constant 0 : i32
    return %c0_i32, %c0_i32_0, %c0_i32_1 : i32, i32, i32
  }
  func.func @transform_4(%arg0: i32) -> (i32, i32) {
    %c0_i32 = arith.constant 0 : i32
    %c0_i32_0 = arith.constant 0 : i32
    return %arg0, %c0_i32 : i32, i32
  }
}

</mosaic_0001>

<bundles_post_ra>
// kernel: _mlp_mach2_call.1
= control target key start
LH: loop header
LB: loop body
LE: loop exit
PB: predicated region body
PF: predicated region fallthrough
CT: control target
= control target key end

     0   :  { %9 = vsyncpa [#allocation3], 0  ;;  %s972_s0 = inlined_call_operand.hbm [shape: f32[8,32], index: 0, kind: input, shape index: {}]   ;;  %s973_s1 = inlined_call_operand.hbm [shape: bf16[32,128], index: 1, kind: input, shape index: {}]   ;;  %s974_s2 = inlined_call_operand.hbm [shape: bf16[4,128,128], index: 2, kind: input, shape index: {}]   ;;  %s975_s3 = inlined_call_operand.vmem [shape: f32[5,1,128], index: 3, kind: input, shape index: {}]   ;;  %s976_s4 = inlined_call_operand.vmem [shape: f32[8,2], index: 4, kind: output, shape index: {}]  }
   0x1   :  { %10 = vsyncpa [#allocation5], 0  ;;  %s869_s15 = smov [#allocation4]  }
   0x2   :  { %s26_s16 = sshll.u32 %s869_s15, 4  ;;  %s27_s16 = int_to_ptr.vmem [resolvable:$true] %s26_s16 }
   0x3   :  { %s813_s17 = scalar_lea.vmem %s27_s16, 256  ;;  %p818_p1 = scmp.lt.s32.totalorder %s27_s16, %s27_s16 }
   0x4   :  { %p814_p0 = scmp.ne.s32.totalorder %s27_s16, %s813_s17  ;;  %p819_p2 = scmp.lt.s32.totalorder %s813_s17, %s813_s17 }
   0x6   :  { %p820_p3 = por %p819_p2, %p818_p1 }
   0x8   :  { %p821_p4 = pnand %p820_p3, %p814_p0 }
   0xa   :  { %824 = shalt.err (!%p821_p4)
}
   0xb   :  { %s870_s18 = smov 64   ;;  %s871_s19 = smov 4  }
   0xc   :  { %32 = dma.hbm_to_vmem [thread:$0]  %s973_s1, 256, %s27_s16, [#allocation5], %s870_s18, %s870_s18, %s871_s19  }
   0xd   :  { %s872_s22 = smov [#allocation2]   ;;  %s873_s24 = smov [#allocation6]  }
   0xe   :  { %s17_s23 = sshll.u32 %s872_s22, 4  ;;  %s38_s25 = sshll.u32 %s873_s24, 4  ;;  %s18_s23 = int_to_ptr.vmem [resolvable:$true] %s17_s23  ;;  %s39_s25 = int_to_ptr.vmem [resolvable:$true] %s38_s25 }
   0xf   :  { %s833_s26 = scalar_lea.vmem %s18_s23, 128  ;;  %p838_p6 = scmp.lt.s32.totalorder %s18_s23, %s18_s23 }
  0x10   :  { %p834_p5 = scmp.ne.s32.totalorder %s18_s23, %s833_s26  ;;  %p839_p7 = scmp.lt.s32.totalorder %s833_s26, %s833_s26 }
  0x12   :  { %p840_p8 = por %p839_p7, %p838_p6 }
  0x14   :  { %p841_p9 = pnand %p840_p8, %p834_p5 }
  0x16   :  { %844 = shalt.err (!%p841_p9)
}
  0x17   :  { %20 = dma.hbm_to_vmem [thread:$0]  %s972_s0, 128, %s18_s23, [#allocation3]  }
  0x18   :  { %s853_s29 = scalar_lea.vmem %s39_s25, 4096  ;;  %p858_p11 = scmp.lt.s32.totalorder %s39_s25, %s39_s25 }
  0x19   :  { %p854_p10 = scmp.ne.s32.totalorder %s39_s25, %s853_s29  ;;  %p859_p12 = scmp.lt.s32.totalorder %s853_s29, %s853_s29 }
  0x1b   :  { %p860_p13 = por %p859_p12, %p858_p11 }
  0x1d   :  { %p861_p0 = pnand %p860_p13, %p854_p10 }
  0x1f   :  { %864 = shalt.err (!%p861_p0)
}
  0x20   :  { %44 = dma.hbm_to_vmem [thread:$0]  %s974_s2, 4096, %s39_s25, [#allocation5], %s870_s18, %s870_s18, %s871_s19  }
  0x21   :  { %865 = dma.done.wait [#allocation3], 128  }
  0x22   :  { %866 = vsyncadd [#allocation3], 4294967168 }
  0x23   :  { %867 = dma.done.wait [#allocation5], 4352  }
  0x24   :  { %868 = vsyncadd [#allocation5], 4294962944  ;;  %v874_v0 = vmov 0.0   ;;  %vm875_vm0 = vmmov 0   ;;  %v771_v1 = vld [vmem:[#allocation4 + $0x8] sm:$0xff]   ;;  %v772_v2 = vld [vmem:[#allocation4] sm:$0xff]  }
  0x25   :  { %676 = vmatprep.subr.bf16.mxu0 %v874_v0  ;;  %680 = vmatprep.mubr.msk.bf16.mxu0 %vm875_vm0, %v874_v0  ;;  %v57_v3 = vld [vmem:[#allocation2] sm:$0xff]  ;;  %v773_v4 = vld [vmem:[#allocation6 + $0x38] sm:$0xff]   ;;  %v774_v6 = vld [vmem:[#allocation6 + $0x30] sm:$0xff]   ;;  %vm82_vm1 = vcmask 261120   ;;  %vm585_vm2 = vcmask 15360  }
  0x26   :  { %684 = vmatprep.subr.bf16.mxu1 %v874_v0  ;;  %700 = vmatprep.mubr.msk.bf16.mxu1 %vm875_vm0, %v874_v0  ;;  %v58_v5 = vpack.c.bf16 %v57_v3, %v57_v3  ;;  %v775_v7 = vld [vmem:[#allocation6 + $0x28] sm:$0xff]   ;;  %v776_v8 = vld [vmem:[#allocation6 + $0x20] sm:$0xff]   ;;  %v777_v9 = vld [vmem:[#allocation6 + $0x18] sm:$0xff]  }
  0x27   :  { %677 = vmatpush3.bf16.msra.mxu0 %v771_v1  ;;  %685 = vmatpush3.bf16.msra.mxu1 %v773_v4  ;;  %v778_v10 = vld [vmem:[#allocation6 + $0x10] sm:$0xff]   ;;  %v779_v11 = vld [vmem:[#allocation6 + $0x8] sm:$0xff]   ;;  %v780_v12 = vld [vmem:[#allocation6] sm:$0xff]  }
  0x28   :  { %678 = vmatprep.subr.bf16.mxu0 %v874_v0  ;;  %686 = vmatprep.subr.bf16.mxu1 %v874_v0  ;;  %v781_v13 = vld [vmem:[#allocation6 + $0x78] sm:$0xff]   ;;  %v782_v14 = vld [vmem:[#allocation6 + $0x70] sm:$0xff]   ;;  %v783_v15 = vld [vmem:[#allocation6 + $0x68] sm:$0xff]  }
  0x29   :  { %v784_v16 = vld [vmem:[#allocation6 + $0x60] sm:$0xff]   ;;  %v785_v17 = vld [vmem:[#allocation6 + $0x58] sm:$0xff]   ;;  %v786_v18 = vld [vmem:[#allocation6 + $0x50] sm:$0xff]  }
  0x2a   :  { %v593_v19 = vld [vmem:[%s975_s3] ss:$0 sm:$0xff]  ;;  %v788_v28 = vld [vmem:[#allocation6 + $0x40] sm:$0xff]   ;;  %v789_v29 = vld [vmem:[#allocation6 + $0xb8] sm:$0xff]  }
  0x2b   :  { %679 = vmatpush3.bf16.msra.mxu0 %v772_v2  ;;  %687 = vmatpush3.bf16.msra.mxu1 %v774_v6  ;;  %v787_v27 = vld [vmem:[#allocation6 + $0x48] sm:$0xff]   ;;  %v790_v30 = vld [vmem:[#allocation6 + $0xb0] sm:$0xff]   ;;  %v792_v32 = vld [vmem:[#allocation6 + $0xa0] sm:$0xff]  }
  0x2c   :  { %704 = vmatprep.subr.bf16.mxu0 %v874_v0  ;;  %688 = vmatprep.subr.bf16.mxu1 %v874_v0  ;;  %v791_v31 = vld [vmem:[#allocation6 + $0xa8] sm:$0xff]   ;;  %v793_v33 = vld [vmem:[#allocation6 + $0x98] sm:$0xff]   ;;  %v794_v34 = vld [vmem:[#allocation6 + $0x90] sm:$0xff]  }
  0x2d   :  { %v598_v35 = vld [vmem:[%s975_s3 + $0x1] ss:$0 sm:$0xff]  ;;  %v796_v44 = vld [vmem:[#allocation6 + $0x80] sm:$0xff]   ;;  %v797_v45 = vld [vmem:[#allocation6 + $0xf8] sm:$0xff]  }
  0x2e   :  { %681 = vmatmul.mubr.msk.bf16.vlgmr.msra.gmra.mxu0 %vm82_vm1, %v58_v5  ;;  %v795_v43 = vld [vmem:[#allocation6 + $0x88] sm:$0xff]   ;;  %v798_v46 = vld [vmem:[#allocation6 + $0xf0] sm:$0xff]   ;;  %v800_v48 = vld [vmem:[#allocation6 + $0xe0] sm:$0xff]  }
  0x2f   :  { %720 = vmatprep.mubr.msk.bf16.mxu0 %vm875_vm0, %v874_v0  ;;  %689 = vmatpush3.bf16.msra.mxu1 %v775_v7  ;;  %v799_v47 = vld [vmem:[#allocation6 + $0xe8] sm:$0xff]   ;;  %v801_v49 = vld [vmem:[#allocation6 + $0xd8] sm:$0xff]   ;;  %v802_v50 = vld [vmem:[#allocation6 + $0xd0] sm:$0xff]  }
  0x30   :  { %690 = vmatprep.subr.bf16.mxu1 %v874_v0  ;;  %705 = vmatpush3.bf16.msra.mxu0 %v781_v13  ;;  %v608_v51 = vld [vmem:[%s975_s3 + $0x2] ss:$0 sm:$0xff]  ;;  %v804_v60 = vld [vmem:[#allocation6 + $0xc0] sm:$0xff]   ;;  %v618_v61 = vld [vmem:[%s975_s3 + $0x3] ss:$0 sm:$0xff] }
  0x31   :  { %706 = vmatprep.subr.bf16.mxu0 %v874_v0  ;;  %v803_v59 = vld [vmem:[#allocation6 + $0xc8] sm:$0xff]  }
  0x32   :  { %v628_v6 = vld [vmem:[%s975_s3 + $0x4] ss:$0 sm:$0xff] }
  0x33   :  { %691 = vmatpush3.bf16.msra.mxu1 %v776_v8 }
  0x34   :  { %692 = vmatprep.subr.bf16.mxu1 %v874_v0  ;;  %707 = vmatpush3.bf16.msra.mxu0 %v782_v14 }
  0x35   :  { %708 = vmatprep.subr.bf16.mxu0 %v874_v0 }
  0x37   :  { %693 = vmatpush3.bf16.msra.mxu1 %v777_v9 }
  0x38   :  { %694 = vmatprep.subr.bf16.mxu1 %v874_v0  ;;  %709 = vmatpush3.bf16.msra.mxu0 %v783_v15 }
  0x39   :  { %710 = vmatprep.subr.bf16.mxu0 %v874_v0 }
  0x3b   :  { %695 = vmatpush3.bf16.msra.mxu1 %v778_v10 }
  0x3c   :  { %696 = vmatprep.subr.bf16.mxu1 %v874_v0  ;;  %711 = vmatpush3.bf16.msra.mxu0 %v784_v16 }
  0x3d   :  { %712 = vmatprep.subr.bf16.mxu0 %v874_v0 }
  0x3f   :  { %697 = vmatpush3.bf16.msra.mxu1 %v779_v11 }
  0x40   :  { %698 = vmatprep.subr.bf16.mxu1 %v874_v0  ;;  %713 = vmatpush3.bf16.msra.mxu0 %v785_v17 }
  0x41   :  { %714 = vmatprep.subr.bf16.mxu0 %v874_v0 }
  0x43   :  { %699 = vmatpush3.bf16.msra.mxu1 %v780_v12 }
  0x44   :  { %724 = vmatprep.subr.bf16.mxu1 %v874_v0  ;;  %715 = vmatpush3.bf16.msra.mxu0 %v786_v18 }
  0x45   :  { %716 = vmatprep.subr.bf16.mxu0 %v874_v0 }
  0x48   :  { %717 = vmatpush3.bf16.msra.mxu0 %v787_v27 }
  0x49   :  { %718 = vmatprep.subr.bf16.mxu0 %v874_v0 }
  0x4c   :  { %719 = vmatpush3.bf16.msra.mxu0 %v788_v28 }
  0x4d   :  { %744 = vmatprep.subr.bf16.mxu0 %v874_v0 }
  0xee   :  { %v120_v20 = vpop.f32.mrf.mxu0 }
  0xef   :  { %v121_v21 = vadd.f32 %v593_v19, %v120_v20 }
  0xf0   :  { %v682_v22 = vpop.f32.mrf.mxu0 }
  0xf1   :  { %v126_v23 = vmax.f32 %v121_v21, 0.0 }
  0xf2   :  { %v123_v24 = vpop.f32.mrf.mxu0 }
  0xf3   :  { %v127_v25 = vpack.c.bf16 %v126_v23, %v126_v23 }
  0xf4   :  { %v683_v26 = vpop.f32.mrf.mxu0 }
  0xf5   :  { %701 = vmatmul.mubr.bf16.vlgmr.msra.gmra.mxu1 %v127_v25 }
  0xf6   :  { %740 = vmatprep.mubr.msk.bf16.mxu1 %vm875_vm0, %v874_v0  ;;  %725 = vmatpush3.bf16.msra.mxu1 %v789_v29 }
  0xf7   :  { %726 = vmatprep.subr.bf16.mxu1 %v874_v0 }
  0xfa   :  { %727 = vmatpush3.bf16.msra.mxu1 %v790_v30 }
  0xfb   :  { %728 = vmatprep.subr.bf16.mxu1 %v874_v0 }
  0xfe   :  { %729 = vmatpush3.bf16.msra.mxu1 %v791_v31 }
  0xff   :  { %730 = vmatprep.subr.bf16.mxu1 %v874_v0 }
 0x102   :  { %731 = vmatpush3.bf16.msra.mxu1 %v792_v32 }
 0x103   :  { %732 = vmatprep.subr.bf16.mxu1 %v874_v0 }
 0x106   :  { %733 = vmatpush3.bf16.msra.mxu1 %v793_v33 }
 0x107   :  { %734 = vmatprep.subr.bf16.mxu1 %v874_v0 }
 0x10a   :  { %735 = vmatpush3.bf16.msra.mxu1 %v794_v34 }
 0x10b   :  { %736 = vmatprep.subr.bf16.mxu1 %v874_v0 }
 0x10e   :  { %737 = vmatpush3.bf16.msra.mxu1 %v795_v43 }
 0x10f   :  { %738 = vmatprep.subr.bf16.mxu1 %v874_v0 }
 0x112   :  { %739 = vmatpush3.bf16.msra.mxu1 %v796_v44 }
 0x1b5   :  { %v234_v36 = vpop.f32.mrf.mxu1 }
 0x1b6   :  { %v235_v37 = vadd.f32 %v598_v35, %v234_v36 }
 0x1b7   :  { %v702_v38 = vpop.f32.mrf.mxu1 }
 0x1b8   :  { %v240_v39 = vmax.f32 %v235_v37, 0.0 }
 0x1b9   :  { %v237_v40 = vpop.f32.mrf.mxu1 }
 0x1ba   :  { %v241_v41 = vpack.c.bf16 %v240_v39, %v240_v39 }
 0x1bb   :  { %v703_v42 = vpop.f32.mrf.mxu1 }
 0x1bc   :  { %721 = vmatmul.mubr.bf16.vlgmr.msra.gmra.mxu0 %v241_v41 }
 0x1bd   :  { %760 = vmatprep.mubr.msk.bf16.mxu0 %vm875_vm0, %v874_v0  ;;  %745 = vmatpush3.bf16.msra.mxu0 %v797_v45 }
 0x1be   :  { %746 = vmatprep.subr.bf16.mxu0 %v874_v0 }
 0x1c1   :  { %747 = vmatpush3.bf16.msra.mxu0 %v798_v46 }
 0x1c2   :  { %748 = vmatprep.subr.bf16.mxu0 %v874_v0 }
 0x1c5   :  { %749 = vmatpush3.bf16.msra.mxu0 %v799_v47 }
 0x1c6   :  { %750 = vmatprep.subr.bf16.mxu0 %v874_v0 }
 0x1c9   :  { %751 = vmatpush3.bf16.msra.mxu0 %v800_v48 }
 0x1ca   :  { %752 = vmatprep.subr.bf16.mxu0 %v874_v0 }
 0x1cd   :  { %753 = vmatpush3.bf16.msra.mxu0 %v801_v49 }
 0x1ce   :  { %754 = vmatprep.subr.bf16.mxu0 %v874_v0 }
 0x1d1   :  { %755 = vmatpush3.bf16.msra.mxu0 %v802_v50 }
 0x1d2   :  { %756 = vmatprep.subr.bf16.mxu0 %v874_v0 }
 0x1d5   :  { %757 = vmatpush3.bf16.msra.mxu0 %v803_v59 }
 0x1d6   :  { %758 = vmatprep.subr.bf16.mxu0 %v874_v0 }
 0x1d9   :  { %759 = vmatpush3.bf16.msra.mxu0 %v804_v60 }
 0x27c   :  { %v349_v52 = vpop.f32.mrf.mxu0 }
 0x27d   :  { %v350_v53 = vadd.f32 %v608_v51, %v349_v52 }
 0x27e   :  { %v722_v54 = vpop.f32.mrf.mxu0 }
 0x27f   :  { %v355_v55 = vmax.f32 %v350_v53, 0.0 }
 0x280   :  { %v352_v56 = vpop.f32.mrf.mxu0 }
 0x281   :  { %v356_v57 = vpack.c.bf16 %v355_v55, %v355_v55 }
 0x282   :  { %v723_v58 = vpop.f32.mrf.mxu0 }
 0x283   :  { %741 = vmatmul.mubr.bf16.vlgmr.msra.gmra.mxu1 %v356_v57 }
 0x343   :  { %v464_v62 = vpop.f32.mrf.mxu1 }
 0x344   :  { %v465_v63 = vadd.f32 %v618_v61, %v464_v62 }
 0x345   :  { %v742_v1 = vpop.f32.mrf.mxu1 }
 0x346   :  { %v470_v2 = vmax.f32 %v465_v63, 0.0 }
 0x347   :  { %v467_v3 = vpop.f32.mrf.mxu1 }
 0x348   :  { %v471_v4 = vpack.c.bf16 %v470_v2, %v470_v2 }
 0x349   :  { %v743_v5 = vpop.f32.mrf.mxu1 }
 0x34a   :  { %761 = vmatmul.mubr.bf16.vlgmr.msra.gmra.mxu0 %v471_v4 }
 0x40a   :  { %v579_v7 = vpop.f32.mrf.mxu0 }
 0x40b   :  { %v580_v0 = vadd.f32 %v628_v6, %v579_v7 }
 0x40c   :  { %v762_v8 = vpop.f32.mrf.mxu0 }
 0x40d   :  { %586 = vst.msk [vmem:[%s976_s4] sm:$0xff] %vm585_vm2, %v580_v0 }
 0x40e   :  { %v582_v9 = vpop.f32.mrf.mxu0 }
 0x410   :  { %v763_v10 = vpop.f32.mrf.mxu0 }
 0x411   :  { %591 = vsyncpa [#allocation3], 1 }
 0x412   :  { %592 = vsyncpa [#allocation5], 1 }

</bundles_post_ra>
